<compile_context>
chip_gen: v7x
topology: tpu7x:2x2x1
jax: 0.10.0
libtpu: 0.0.40
codegen_flags: <defaults>
</compile_context>

<pallas_src>
import functools

import jax
import jax.numpy as jnp
from jax import lax
from jax.experimental import pallas as pl
from jax.experimental.pallas import tpu as pltpu


def _sdpa_kernel(*refs, scale, has_mask, fold_scale, emit_attn):
    it = iter(refs)
    q_ref = next(it)
    k_ref = next(it)
    v_ref = next(it)
    mask_ref = next(it) if has_mask else None
    ctx_ref = next(it)
    attn_ref = next(it) if emit_attn else None

    q = q_ref[...]                     # (TQ, D) input dtype -- MXU operand
    k = k_ref[...]                     # (S,  D)
    v = v_ref[...]                     # (S,  D)

    if scale and fold_scale:
        # Fold the scale into the small (TQ, D) q tile (safe for f32/bf16).
        q = q * jnp.asarray(scale, dtype=q.dtype)

    # scores = q @ k^T -- contraction on the last axes, no explicit transpose.
    scores = lax.dot_general(
        q, k, dimension_numbers=(((1,), (1,)), ((), ())),
        preferred_element_type=jnp.float32)               # (TQ, S) f32

    if scale and not fold_scale:
        # 8-bit inputs: apply the scale to the f32 scores (no fp8 clipping).
        scores = scores * jnp.float32(scale)

    if has_mask:
        scores = jnp.where(mask_ref[...] != 0, jnp.float32(-1000000000.0),
                           scores)

    # Numerically-stable softmax along the last axis (PyTorch dim=2).
    m = jnp.max(scores, axis=-1, keepdims=True)
    e = jnp.exp(scores - m)
    denom = jnp.sum(e, axis=-1, keepdims=True)
    # Exact divide: this map is returned to the caller and feeds the context;
    # approx reciprocal previously broke the 2e-3 tolerance.
    p = e / denom                                          # (TQ, S) f32

    # TODO(synk): dropout with p>0 would need pltpu.prng_seed/prng_random_bits;
    # attention_dropout defaults to 0.0 so it is an identity here.

    # context = attention @ v -- feed narrow dtype back to the MXU.
    ctx = jnp.dot(p.astype(v.dtype), v, preferred_element_type=jnp.float32)

    ctx_ref[...] = ctx.astype(ctx_ref.dtype)
    if emit_attn:
        attn_ref[...] = p.astype(attn_ref.dtype)


def _tpu_vmem_capacity():
    """(capacity_bytes, detected).  Falls back to 64 MiB (safe on all gens)."""
    try:
        info = pltpu.get_tpu_info()
        cap = int(getattr(info, "vmem_capacity_bytes", 0))
        if cap > 0:
            return cap, True
    except Exception:
        pass
    return 64 << 20, False


def _vmem_bytes(TQ, S, D, io_itemsize, attn_itemsize, has_mask, emit_attn):
    """Footprint of one grid step with double-buffered tiles + f32 temps."""
    nbytes = 2 * TQ * D * io_itemsize          # q tile
    nbytes += 2 * TQ * D * io_itemsize         # ctx tile
    nbytes += 2 * 2 * S * D * io_itemsize      # k, v (full sequence, resident)
    if emit_attn:
        nbytes += 2 * TQ * S * attn_itemsize   # attn tile
    if has_mask:
        nbytes += 2 * TQ * S * 1               # int8 mask tile
    nbytes += 6 * TQ * S * 4                   # f32 scores/exp/prob temps
    nbytes += 2 << 20                          # compiler slack
    return nbytes


def _pick_query_tile(S, footprint_fn, budget, tq_cap):
    """Largest power-of-two tile (<= tq_cap) dividing S whose footprint fits."""
    for cand in (512, 256, 128, 64, 32, 16, 8):
        if cand > tq_cap or S % cand != 0:
            continue
        if footprint_fn(cand) <= budget:
            return cand
    # Best effort: smallest nice divisor, else the whole sequence.
    for cand in (8, 16, 32, 64, 128, 256, 512):
        if cand <= tq_cap and S % cand == 0:
            return cand
    return S


def scaled_dot_product_attention(k, q, v, scale=None, attn_mask=None,
                                 need_attention=True, attn_dtype=None):
    """Matches ScaledDotProductAttention.forward(k, q, v, scale, attn_mask).

    need_attention=False skips the (B,S,S) attention-map output (returns
    (context, None)).  attn_dtype lets callers narrow the map (e.g. bf16).
    NOTE: `if scale:` means scale==0.0 skips scaling (bug-for-bug w/ PyTorch).
    """
    B, S, D = q.shape
    assert k.shape == (B, S, D) and v.shape == (B, S, D)

    has_mask = attn_mask is not None
    emit_attn = bool(need_attention)
    io_itemsize = jnp.dtype(q.dtype).itemsize
    if attn_dtype is None:
        attn_dtype = q.dtype
    attn_itemsize = jnp.dtype(attn_dtype).itemsize if emit_attn else 0
    fold_scale = io_itemsize >= 2      # fp8: scale the f32 scores instead

    capacity, detected = _tpu_vmem_capacity()
    tq_cap = 256 if (detected and capacity <= (64 << 20)) else 512
    budget = int(capacity * 0.80)

    footprint = functools.partial(
        _vmem_bytes, S=S, D=D, io_itemsize=io_itemsize,
        attn_itemsize=attn_itemsize, has_mask=has_mask, emit_attn=emit_attn)
    TQ = _pick_query_tile(S, footprint, budget, tq_cap)
    vmem_limit = int(min(max(footprint(TQ), 32 << 20), int(capacity * 0.85)))

    kernel = functools.partial(_sdpa_kernel, scale=scale, has_mask=has_mask,
                               fold_scale=fold_scale, emit_attn=emit_attn)

    # Leading batch dim is squeezed out of the kernel refs (2-D VMEM tiles).
    q_spec = pl.BlockSpec((None, TQ, D), lambda b, qi: (b, qi, 0))
    kv_spec = pl.BlockSpec((None, S, D), lambda b, qi: (b, 0, 0))  # resident over qi
    map_spec = pl.BlockSpec((None, TQ, S), lambda b, qi: (b, qi, 0))

    in_specs = [q_spec, kv_spec, kv_spec]
    args = [q, k, v]
    if has_mask:
        in_specs.append(map_spec)
        args.append(attn_mask.astype(jnp.int8))   # 1 byte/elem of HBM traffic

    out_shapes = [jax.ShapeDtypeStruct((B, S, D), q.dtype)]
    out_specs = [q_spec]
    if emit_attn:
        out_shapes.append(jax.ShapeDtypeStruct((B, S, S), attn_dtype))
        out_specs.append(map_spec)

    # Advisory cost: two S^2*D matmuls, S^2 exps, and the (dominant) S^2 map.
    flops = 4 * B * S * S * D
    bytes_accessed = 4 * B * S * D * io_itemsize       # q, k, v in + ctx out
    if emit_attn:
        bytes_accessed += B * S * S * attn_itemsize
    if has_mask:
        bytes_accessed += B * S * S                     # int8 mask
    cost = pl.CostEstimate(flops=flops, transcendentals=B * S * S,
                           bytes_accessed=bytes_accessed)

    results = pl.pallas_call(
        kernel,
        out_shape=tuple(out_shapes),
        grid=(B, S // TQ),
        in_specs=in_specs,
        out_specs=tuple(out_specs),
        compiler_params=pltpu.CompilerParams(
            dimension_semantics=("parallel", "parallel"),
            vmem_limit_bytes=vmem_limit,
        ),
        cost_estimate=cost,
    )(*args)

    if emit_attn:
        ctx, attn = results
        return ctx, attn
    (ctx,) = results
    return ctx, None


def _reference(k, q, v, scale=None, attn_mask=None):
    attention = jnp.einsum("bqd,bkd->bqk",
                           q.astype(jnp.float32), k.astype(jnp.float32))
    if scale:
        attention = attention * scale
    if attn_mask is not None:
        attention = jnp.where(attn_mask, -1000000000.0, attention)
    attention = jax.nn.softmax(attention, axis=2)
    context = jnp.einsum("bqk,bkd->bqd", attention, v.astype(jnp.float32))
    return context.astype(q.dtype), attention.astype(q.dtype)


if __name__ == "__main__":
    key = jax.random.PRNGKey(0)
    B, S, D = 2, 8, 32
    kq, kk, kv, km = jax.random.split(key, 4)

    q = jax.random.normal(kq, (B, S, D), dtype=jnp.float32)
    k = jax.random.normal(kk, (B, S, D), dtype=jnp.float32)
    v = jax.random.normal(kv, (B, S, D), dtype=jnp.float32)
    # Deterministic boolean attention mask (True = masked position).
    attn_mask = jax.random.bernoulli(km, p=0.25, shape=(B, S, S))
    scale = 1.0 / (D ** 0.5)

    # Masked + scaled path.
    ctx, attn = scaled_dot_product_attention(k, q, v, scale=scale,
                                             attn_mask=attn_mask)
    jax.block_until_ready((ctx, attn))
    ctx_ref, attn_ref = _reference(k, q, v, scale=scale, attn_mask=attn_mask)
    assert jnp.allclose(ctx, ctx_ref, atol=2e-3, rtol=2e-3), "ctx (masked)"
    assert jnp.allclose(attn, attn_ref, atol=2e-3, rtol=2e-3), "attn (masked)"

    # Unmasked / unscaled path (mask input and jnp.where compiled out).
    ctx2, attn2 = scaled_dot_product_attention(k, q, v)
    jax.block_until_ready((ctx2, attn2))
    ctx2_ref, attn2_ref = _reference(k, q, v)
    assert jnp.allclose(ctx2, ctx2_ref, atol=2e-3, rtol=2e-3), "ctx (unmasked)"
    assert jnp.allclose(attn2, attn2_ref, atol=2e-3, rtol=2e-3), "attn (unmasked)"

    # Context-only fast path: the (B,S,S) writeback is skipped entirely.
    ctx3, no_attn = scaled_dot_product_attention(k, q, v, scale=scale,
                                                 attn_mask=attn_mask,
                                                 need_attention=False)
    jax.block_until_ready(ctx3)
    assert no_attn is None
    assert jnp.allclose(ctx3, ctx_ref, atol=2e-3, rtol=2e-3), "ctx (no-attn)"

    # Narrow (bf16) attention-map variant: halves the S^2 HBM writeback.
    ctx4, attn4 = scaled_dot_product_attention(k, q, v, scale=scale,
                                               attn_mask=attn_mask,
                                               attn_dtype=jnp.bfloat16)
    jax.block_until_ready((ctx4, attn4))
    assert jnp.allclose(ctx4, ctx_ref, atol=2e-3, rtol=2e-3), "ctx (bf16 attn)"
    assert jnp.allclose(attn4.astype(jnp.float32), attn_ref,
                        atol=3e-2, rtol=3e-2), "attn (bf16 attn)"

    print("KERNEL_OK")
</pallas_src>

<mosaic_0001>
module attributes {stable_mosaic.version = 11 : i64} {
  func.func @_sdpa_kernel(%arg0: i32, %arg1: i32, %arg2: memref<1x8x32xf32, #tpu.memory_space<vmem>>, %arg3: memref<1x8x32xf32, #tpu.memory_space<vmem>>, %arg4: memref<1x8x32xf32, #tpu.memory_space<vmem>>, %arg5: memref<1x8x8xi8, #tpu.memory_space<vmem>>, %arg6: memref<1x8x32xf32, #tpu.memory_space<vmem>>, %arg7: memref<1x8x8xf32, #tpu.memory_space<vmem>>) attributes {dimension_semantics = [#tpu.dimension_semantics<parallel>, #tpu.dimension_semantics<parallel>], iteration_bounds = array<i64: 2, 1>, scalar_prefetch = 0 : i64, scratch_operands = 0 : i64, tpu.core_type = #tpu.core_type<tc>, window_params = [{transform_indices = @transform_0, window_bounds = array<i64: 1, 8, 32>}, {transform_indices = @transform_1, window_bounds = array<i64: 1, 8, 32>}, {transform_indices = @transform_2, window_bounds = array<i64: 1, 8, 32>}, {transform_indices = @transform_3, window_bounds = array<i64: 1, 8, 8>}, {transform_indices = @transform_4, window_bounds = array<i64: 1, 8, 32>}, {transform_indices = @transform_5, window_bounds = array<i64: 1, 8, 8>}]} {
    %c0 = arith.constant 0 : index
    %c0_0 = arith.constant 0 : index
    %c0_1 = arith.constant 0 : index
    %0 = vector.load %arg2[%c0, %c0_0, %c0_1] : memref<1x8x32xf32, #tpu.memory_space<vmem>>, vector<1x8x32xf32>
    %1 = vector.shape_cast %0 : vector<1x8x32xf32> to vector<8x32xf32>
    %c0_2 = arith.constant 0 : index
    %c0_3 = arith.constant 0 : index
    %c0_4 = arith.constant 0 : index
    %2 = vector.load %arg3[%c0_2, %c0_3, %c0_4] : memref<1x8x32xf32, #tpu.memory_space<vmem>>, vector<1x8x32xf32>
    %3 = vector.shape_cast %2 : vector<1x8x32xf32> to vector<8x32xf32>
    %c0_5 = arith.constant 0 : index
    %c0_6 = arith.constant 0 : index
    %c0_7 = arith.constant 0 : index
    %4 = vector.load %arg4[%c0_5, %c0_6, %c0_7] : memref<1x8x32xf32, #tpu.memory_space<vmem>>, vector<1x8x32xf32>
    %5 = vector.shape_cast %4 : vector<1x8x32xf32> to vector<8x32xf32>
    %cst = arith.constant 0.176776692 : f32
    %6 = vector.broadcast %cst : f32 to vector<8x32xf32>
    %7 = arith.mulf %1, %6 : vector<8x32xf32>
    %cst_8 = arith.constant dense<0.000000e+00> : vector<8x8xf32>
    %8 = tpu.matmul %7, %3, %cst_8 {dimension_numbers = #tpu.dot_dimension_numbers<[1], [1], [0], [0], [0, 0, 1, 0], [], []>} : vector<8x32xf32>, vector<8x32xf32>, vector<8x8xf32> -> vector<8x8xf32>
    %c0_9 = arith.constant 0 : index
    %c0_10 = arith.constant 0 : index
    %c0_11 = arith.constant 0 : index
    %9 = vector.load %arg5[%c0_9, %c0_10, %c0_11] : memref<1x8x8xi8, #tpu.memory_space<vmem>>, vector<1x8x8xi8>
    %10 = vector.shape_cast %9 : vector<1x8x8xi8> to vector<8x8xi8>
    %c0_i8 = arith.constant 0 : i8
    %11 = vector.broadcast %c0_i8 : i8 to vector<8x8xi8>
    %12 = arith.cmpi ne, %10, %11 : vector<8x8xi8>
    %cst_12 = arith.constant -1.000000e+09 : f32
    %13 = vector.broadcast %cst_12 : f32 to vector<8x8xf32>
    %14 = arith.select %12, %13, %8 : vector<8x8xi1>, vector<8x8xf32>
    %cst_13 = arith.constant dense<0xFF800000> : vector<8xf32>
    %15 = vector.multi_reduction <maximumf>, %14, %cst_13 [1] : vector<8x8xf32> to vector<8xf32>
    %16 = vector.shape_cast %15 : vector<8xf32> to vector<8x1xf32>
    %17 = vector.broadcast %16 : vector<8x1xf32> to vector<8x8xf32>
    %18 = arith.subf %14, %17 : vector<8x8xf32>
    %19 = math.exp %18 : vector<8x8xf32>
    %cst_14 = arith.constant dense<0.000000e+00> : vector<8xf32>
    %20 = vector.multi_reduction <add>, %19, %cst_14 [1] : vector<8x8xf32> to vector<8xf32>
    %21 = vector.shape_cast %20 : vector<8xf32> to vector<8x1xf32>
    %22 = vector.broadcast %21 : vector<8x1xf32> to vector<8x8xf32>
    %23 = arith.divf %19, %22 : vector<8x8xf32>
    %cst_15 = arith.constant dense<0.000000e+00> : vector<8x32xf32>
    %24 = tpu.matmul %23, %5, %cst_15 {dimension_numbers = #tpu.dot_dimension_numbers<[1], [0], [0], [1], [0, 0, 1, 1], [], []>} : vector<8x8xf32>, vector<8x32xf32>, vector<8x32xf32> -> vector<8x32xf32>
    %c0_16 = arith.constant 0 : index
    %c0_17 = arith.constant 0 : index
    %c0_18 = arith.constant 0 : index
    %25 = vector.load %arg6[%c0_16, %c0_17, %c0_18] : memref<1x8x32xf32, #tpu.memory_space<vmem>>, vector<1x8x32xf32>
    %26 = vector.shape_cast %25 : vector<1x8x32xf32> to vector<8x32xf32>
    %27 = vector.shape_cast %24 : vector<8x32xf32> to vector<1x8x32xf32>
    tpu.vector_store %arg6[%c0_16, %c0_17, %c0_18], %27 {strides = array<i32>} : memref<1x8x32xf32, #tpu.memory_space<vmem>>, vector<1x8x32xf32>,
    %c0_19 = arith.constant 0 : index
    %c0_20 = arith.constant 0 : index
    %c0_21 = arith.constant 0 : index
    %28 = vector.load %arg7[%c0_19, %c0_20, %c0_21] : memref<1x8x8xf32, #tpu.memory_space<vmem>>, vector<1x8x8xf32>
    %29 = vector.shape_cast %28 : vector<1x8x8xf32> to vector<8x8xf32>
    %30 = vector.shape_cast %23 : vector<8x8xf32> to vector<1x8x8xf32>
    tpu.vector_store %arg7[%c0_19, %c0_20, %c0_21], %30 {strides = array<i32>} : memref<1x8x8xf32, #tpu.memory_space<vmem>>, vector<1x8x8xf32>,
    return
  }
  func.func @transform_0(%arg0: i32, %arg1: i32) -> (i32, i32, i32) {
    %c0_i32 = arith.constant 0 : i32
    %c0_i32_0 = arith.constant 0 : i32
    return %arg0, %arg1, %c0_i32 : i32, i32, i32
  }
  func.func @transform_1(%arg0: i32, %arg1: i32) -> (i32, i32, i32) {
    %c0_i32 = arith.constant 0 : i32
    %c0_i32_0 = arith.constant 0 : i32
    %c0_i32_1 = arith.constant 0 : i32
    return %arg0, %c0_i32, %c0_i32_0 : i32, i32, i32
  }
  func.func @transform_2(%arg0: i32, %arg1: i32) -> (i32, i32, i32) {
    %c0_i32 = arith.constant 0 : i32
    %c0_i32_0 = arith.constant 0 : i32
    %c0_i32_1 = arith.constant 0 : i32
    return %arg0, %c0_i32, %c0_i32_0 : i32, i32, i32
  }
  func.func @transform_3(%arg0: i32, %arg1: i32) -> (i32, i32, i32) {
    %c0_i32 = arith.constant 0 : i32
    %c0_i32_0 = arith.constant 0 : i32
    return %arg0, %arg1, %c0_i32 : i32, i32, i32
  }
  func.func @transform_4(%arg0: i32, %arg1: i32) -> (i32, i32, i32) {
    %c0_i32 = arith.constant 0 : i32
    %c0_i32_0 = arith.constant 0 : i32
    return %arg0, %arg1, %c0_i32 : i32, i32, i32
  }
  func.func @transform_5(%arg0: i32, %arg1: i32) -> (i32, i32, i32) {
    %c0_i32 = arith.constant 0 : i32
    %c0_i32_0 = arith.constant 0 : i32
    return %arg0, %arg1, %c0_i32 : i32, i32, i32
  }
}

</mosaic_0001>

<bundles_post_ra>
// kernel: tpu_custom_call.1
= control target key start
LH: loop header
LB: loop body
LE: loop exit
PB: predicated region body
PF: predicated region fallthrough
CT: control target
= control target key end

     0   :  { %s1426_s0 = inlined_call_operand.hbm [shape: f32[2,8,32], index: 0, kind: input, shape index: {}]   ;;  %s1427_s1 = inlined_call_operand.hbm [shape: f32[2,8,32], index: 1, kind: input, shape index: {}]   ;;  %s1428_s2 = inlined_call_operand.hbm [shape: f32[2,8,32], index: 2, kind: input, shape index: {}]   ;;  %s1429_s3 = inlined_call_operand.vmem [shape: s8[2,8,8], index: 3, kind: input, shape index: {}]   ;;  %s1430_s4 = inlined_call_operand.hbm [shape: f32[2,8,32], index: 4, kind: output, shape index: {0}]   ;;  %s1431_s5 = inlined_call_operand.hbm [shape: f32[2,8,8], index: 5, kind: output, shape index: {1}]  }
   0x1   :  { %1441 = sst [smem:[#allocation20_spill]] %s1427_s1 }
   0x2   :  { %11 = vsyncpa [#allocation3], 0 }
   0x3   :  { %13 = vsyncpa [#allocation3 + $0x1], 0 }
   0x4   :  { %14 = vsyncpa [#allocation6], 0 }
   0x5   :  { %16 = vsyncpa [#allocation6 + $0x1], 0 }
   0x6   :  { %17 = vsyncpa [#allocation4], 0 }
   0x7   :  { %19 = vsyncpa [#allocation4 + $0x1], 0 }
   0x8   :  { %20 = vsyncpa [#allocation10], 0 }
   0x9   :  { %22 = vsyncpa [#allocation10 + $0x1], 0  ;;  %s1122_s18 = smov 0   ;;  %s1124_s19 = smov 0  }
   0xa   :  { %s1126_s20 = smov 0   ;;  %s1128_s21 = smov 0  }
   0xb   :  { %s1130_s22 = smov 0   ;;  %s1132_s23 = smov 0  }
   0xc LB: > { %1442 = sst [smem:[#allocation15_spill]] %s1078_s22  ;;  %s1153_s24 = sadd.s32 4294967295, %s1082_s23   ;;  %s1082_s23 = sphi %s1132_s23, %s28_s23   ;;  %s1078_s22 = sphi %s1130_s22, %s1468_s22   ;;  %s1074_s21 = sphi %s1128_s21, %s1467_s21   ;;  %s1070_s20 = sphi %s1126_s20, %s1471_s20   ;;  %s1066_s19 = sphi %s1124_s19, %s1470_s19   ;;  %s1062_s18 = sphi %s1122_s18, %s1469_s18  }
   0xd   : > { %1443 = sst [smem:[#allocation16_spill]] %s1082_s23  ;;  %s751_s25 = sadd.s32 4294967294, %s1082_s23  }
   0xe   : > { %s40_s26 = sadd.s32 1, %s1078_s22  ;;  %s49_s27 = sadd.s32 1, %s1070_s20 }
   0xf   : > { %p42_p0 = scmp.ge.s32.totalorder %s40_s26, 2  ;;  %p56_p1 = scmp.ne.s32.totalorder %s1070_s20, %s1066_s19 }
  0x10   : > { %p57_p2 = scmp.eq.s32.totalorder %s1082_s23, 0  ;;  %p62_p3 = scmp.ne.s32.totalorder %s1066_s19, %s1062_s18 }
  0x11   : > { %s1473_s26 = smov (%p42_p0, %s40_s26), 0  ;;  %p63_p5 = scmp.eq.s32.totalorder %s1153_s24, 0 }
  0x12   : > { %1444 = sst [smem:[#allocation17_spill]] %s1473_s26  ;;  %p1165_p4 = por %p57_p2, %p56_p1 }
  0x13   : > { %s44_s29 = ssub.s32 %s1078_s22, %s1473_s26  ;;  %p168_p6 = scmp.eq.s32.totalorder %s1153_s24, 1 }
  0x14   : > { %p47_p7 = scmp.eq.s32.totalorder %s44_s29, 0  ;;  %p1173_p8 = por %p63_p5, %p62_p3 }
  0x15   : > { %p1177_p9 = por %p168_p6, %p56_p1  ;;  %p174_p10 = scmp.eq.s32.totalorder %s751_s25, 1 }
  0x16   : > { %s1446_s30 = scalar_select %p1173_p8, 1, 0 }
  0x17   : > { %s1447_s6 = scalar_select %p1177_p9, 1, 0 }
  0x18   : > { %s1182_s7 = scalar_select %p47_p7, %s1070_s20, %s49_s27  }
  0x19   : > { %p1184_p11 = por %p174_p10, %p62_p3  ;;  %p817_p13 = scmp.lt.s32.totalorder %s1082_s23, 2 }
  0x1a   : > { %1448 = sst [smem:[#allocation18_spill]] %s1182_s7  ;;  %s1432_s9 = sand.u32 1, %s1070_s20  }
  0x1b   : > { %s1449_s8 = scalar_select %p1184_p11, 1, 0 }
  0x1c   : > { %s1193_s10 = sshll.u32 %s1432_s9, 3  ;;  %s1196_s11 = sshll.u32 %s1078_s22, 7 }
  0x1d   : > { %1450 = sst [smem:[#allocation19_spill]] %s1449_s8  ;;  %p1200_p0 = pnand %p817_p13, %p1165_p4 }
  0x1e   : > { %s241_s13 = sand.u32 1, %s1082_s23   ;;  %s1452_s1 = sld [smem:[#allocation20_spill]] }
  0x1f   : > { %s1451_s12 = scalar_select %p1200_p0, 1, 0 }
  0x20   : > { %s245_s17 = scalar_lea.vmem [#allocation5], %s1193_s10  ;;  %s1216_s27 = scalar_lea.sflag [#allocation6], %s241_s13 }
  0x21   : > { %s252_s25 = sshll.u32 %s245_s17, 4  ;;  %p1222_p4 = pneg %p1200_p0  ;;  %s1213_s25 = int_to_ptr.vmem [resolvable:$true] %s252_s25 }
  0x24   : > { %s1209_s16 = scalar_lea.hbm %s1452_s1, %s1196_s11  ;;  %s879_s17 = scalar_lea.hbm %s1452_s1, 256 }
  0x25   : > { %s874_s28 = scalar_lea.hbm %s1209_s16, 128  ;;  %p880_p7 = scmp.lt.u32.totalorder %s1209_s16, %s1452_s1 }
  0x26   : > { %p875_p3 = scmp.ne.s32.totalorder %s1209_s16, %s874_s28  ;;  %p881_p10 = scmp.lt.u32.totalorder %s879_s17, %s874_s28 }
  0x27   : > { %p883_p12 = scmp.lt.u32.totalorder %s874_s28, %s1209_s16 }
  0x28   : > { %p877_p5 = pnand %p1222_p4, %p875_p3  ;;  %p882_p13 = por %p881_p10, %p880_p7 }
  0x2a   : > { %p878_p6 = pneg %p877_p5  ;;  %p884_p1 = por %p883_p12, %p882_p13 }
  0x2c   : > { %p885_p2 = pnand %p884_p1, %p878_p6 }
  0x2e   : > { %888 = shalt.err (!%p885_p2)
}
  0x2f   : > { %s889_s13 = scalar_lea.vmem %s1213_s25, 128  ;;  %s1084_s14 = smov [#allocation5]  }
  0x30   : > { %p890_p3 = scmp.ne.s32.totalorder %s1213_s25, %s889_s13  ;;  %s894_s15 = sshll.u32 %s1084_s14, 4  ;;  %s895_s15 = int_to_ptr.vmem [resolvable:$false] %s894_s15 }
  0x31   : > { %s896_s26 = scalar_lea.vmem %s895_s15, 256  ;;  %p897_p9 = scmp.lt.s32.totalorder %s1213_s25, %s895_s15 }
  0x32   : > { %p892_p5 = pnand %p890_p3, %p1222_p4  ;;  %p898_p8 = scmp.lt.s32.totalorder %s896_s26, %s889_s13 }
  0x34   : > { %p893_p11 = pneg %p892_p5  ;;  %p899_p7 = por %p898_p8, %p897_p9 }
  0x36   : > { %p900_p10 = pnand %p899_p7, %p893_p11 }
  0x38   : > { %903 = shalt.err (!%p900_p10)
}
  0x39   : > { %806 = dma.hbm_to_vmem [thread:$0]  (!%p1200_p0), %s1209_s16, 128, %s1213_s25, %s1216_s27  }
  0x3a   : > { %p1454_p12 = scmp.lt.s32.totalorder %s1082_s23, 3  ;;  %p1455_p1 = scmp.ge.s32.totalorder %s1082_s23, 1 }
  0x3b   : > { %s1258_s13 = scalar_lea.hbm %s1426_s0, %s1196_s11  ;;  %s226_s14 = scalar_lea.vmem [#allocation2], %s1193_s10 }
  0x3c   : > { %p1250_p2 = pnand %p1455_p1, %p1454_p12  ;;  %s234_s15 = sshll.u32 %s226_s14, 4  ;;  %s1261_s15 = int_to_ptr.vmem [resolvable:$true] %s234_s15 }
  0x3d   : > { %s1267_s26 = scalar_lea.hbm %s1428_s2, %s1196_s11  ;;  %s1457_s1 = sand.u32 1, %s1070_s20  }
  0x3e   : > { %s1456_s9 = scalar_select %p1250_p2, 1, 0 }
  0x3f   : > { %s223_s22 = scalar_lea.sflag [#allocation3], %s1457_s1  ;;  %s904_s7 = scalar_lea.hbm %s1258_s13, 128 }
  0x40   : > { %p905_p8 = scmp.ne.s32.totalorder %s1258_s13, %s904_s7  ;;  %s909_s23 = scalar_lea.hbm %s1426_s0, 256 }
  0x41   : > { %p910_p6 = scmp.lt.u32.totalorder %s1258_s13, %s1426_s0  ;;  %p911_p13 = scmp.lt.u32.totalorder %s909_s23, %s904_s7 }
  0x42   : > { %p907_p9 = pnand %p905_p8, %p1222_p4  ;;  %p913_p5 = scmp.lt.u32.totalorder %s904_s7, %s1258_s13 }
  0x43   : > { %p912_p3 = por %p911_p13, %p910_p6 }
  0x44   : > { %p908_p11 = pneg %p907_p9 }
  0x45   : > { %p914_p7 = por %p913_p5, %p912_p3 }
  0x47   : > { %p915_p10 = pnand %p914_p7, %p908_p11 }
  0x49   : > { %918 = shalt.err (!%p915_p10)
}
  0x4a   : > { %s919_s1 = scalar_lea.vmem %s1261_s15, 128  ;;  %s1085_s11 = smov [#allocation2]  }
  0x4b   : > { %p920_p12 = scmp.ne.s32.totalorder %s1261_s15, %s919_s1  ;;  %s924_s16 = sshll.u32 %s1085_s11, 4  ;;  %s925_s16 = int_to_ptr.vmem [resolvable:$false] %s924_s16 }
  0x4c   : > { %s926_s8 = scalar_lea.vmem %s925_s16, 256  ;;  %p927_p9 = scmp.lt.s32.totalorder %s1261_s15, %s925_s16 }
  0x4d   : > { %p922_p1 = pnand %p920_p12, %p1222_p4  ;;  %p928_p2 = scmp.lt.s32.totalorder %s926_s8, %s919_s1 }
  0x4f   : > { %p923_p8 = pneg %p922_p1  ;;  %p929_p6 = por %p928_p2, %p927_p9 }
  0x51   : > { %p930_p13 = pnand %p929_p6, %p923_p8 }
  0x53   : > { %933 = shalt.err (!%p930_p13)
}
  0x54   : > { %803 = dma.hbm_to_vmem [thread:$0]  (!%p1200_p0), %s1258_s13, 128, %s1261_s15, %s223_s22  }
  0x55   : > { %s263_s23 = scalar_lea.vmem [#allocation7], %s1193_s10  ;;  %s934_s25 = scalar_lea.hbm %s1267_s26, 128 }
  0x56   : > { %s270_s7 = sshll.u32 %s263_s23, 4  ;;  %p935_p11 = scmp.ne.s32.totalorder %s1267_s26, %s934_s25  ;;  %s271_s7 = int_to_ptr.vmem [resolvable:$true] %s270_s7 }
  0x57   : > { %s939_s14 = scalar_lea.hbm %s1428_s2, 256  ;;  %p940_p5 = scmp.lt.u32.totalorder %s1267_s26, %s1428_s2 }
  0x58   : > { %p937_p2 = pnand %p935_p11, %p1222_p4  ;;  %p941_p7 = scmp.lt.u32.totalorder %s939_s14, %s934_s25 }
  0x59   : > { %p943_p12 = scmp.lt.u32.totalorder %s934_s25, %s1267_s26 }
  0x5a   : > { %p938_p3 = pneg %p937_p2  ;;  %p942_p10 = por %p941_p7, %p940_p5 }
  0x5c   : > { %p944_p1 = por %p943_p12, %p942_p10 }
  0x5e   : > { %p945_p8 = pnand %p944_p1, %p938_p3 }
  0x60   : > { %948 = shalt.err (!%p945_p8)
}
  0x61   : > { %s949_s22 = scalar_lea.vmem %s271_s7, 128  ;;  %s1086_s10 = smov [#allocation7]  }
  0x62   : > { %p950_p9 = scmp.ne.s32.totalorder %s271_s7, %s949_s22  ;;  %s954_s13 = sshll.u32 %s1086_s10, 4  ;;  %s955_s13 = int_to_ptr.vmem [resolvable:$false] %s954_s13 }
  0x63   : > { %s956_s15 = scalar_lea.vmem %s955_s13, 256  ;;  %p957_p11 = scmp.lt.s32.totalorder %s271_s7, %s955_s13 }
  0x64   : > { %p952_p6 = pnand %p950_p9, %p1222_p4  ;;  %p958_p2 = scmp.lt.s32.totalorder %s956_s15, %s949_s22 }
  0x66   : > { %p953_p13 = pneg %p952_p6  ;;  %p959_p0 = por %p958_p2, %p957_p11 }
  0x68   : > { %p960_p5 = pnand %p959_p0, %p953_p13 }
  0x6a   : > { %963 = shalt.err (!%p960_p5)
}
  0x6b   : > { %p1458_p7 = scmp.ne.s32.totalorder %s1451_s12, 0  ;;  %p1459_p3 = scmp.ne.s32.totalorder %s1456_s9, 0 }
  0x6c   : > { %s1314_s29 = sand.u32 (!%p1459_p3), 1, %s1066_s19   ;;  %p1460_p0 = scmp.ne.s32.totalorder (!%p1459_p3), %s1446_s30, 0 }
  0x6d   : > { %809 = dma.hbm_to_vmem [thread:$0]  (!%p1458_p7), %s1267_s26, 128, %s271_s7, %s1216_s27  }
  0x6e   : > { %289 = sbr.rel (%p1459_p3) target bundleno = 880 (0x370), region = 36  ;;  %s1317_s16 = sshll.u32 (!%p1459_p3), %s1314_s29, 3 }
  0x6f   : > { %s292_s8 = scalar_lea.sflag (!%p1459_p3), [#allocation3], %s1314_s29  ;;  %s295_s23 = scalar_lea.vmem (!%p1459_p3), [#allocation2], %s1317_s16 }
  0x75   : > { %1045 = dma.done.wait (%p1460_p0), %s292_s8, 128  }
  0x76   : > { %1047 = vsyncadd (%p1460_p0), %s292_s8, 4294967168  ;;  %s300_s12 = sand.u32 1, %s1153_s24   ;;  %s304_s9 = scalar_lea.vmem [#allocation5], %s1317_s16 }
  0x77   : > { %s301_s27 = scalar_lea.sflag [#allocation6], %s300_s12 }
  0x78   : > { %1049 = dma.done.wait (%p1460_p0), %s301_s27, 256  }
  0x79   : > { %1051 = vsyncadd (%p1460_p0), %s301_s27, 4294967040  ;;  %v1087_v0 = vmov 0.0   ;;  %vm1088_vm0 = vmmov 0   ;;  %vm375_vm1 = vcmask 261120   ;;  %v372_v1 = vld [vmem:[%s304_s9] sm:$0xff]  ;;  %v371_v2 = vld [vmem:[%s295_s23] sm:$0xff] }
  0x7a   : > { %780 = vmatprep.subr.mxu0 %v1087_v0  ;;  %782 = vmatprep.mubr.msk.f32.mxu0 %vm1088_vm0, %v1087_v0  ;;  %v374_v3 = vmul.f32 0.17677669, %v371_v2  ;;  %p362_p4 = scmp.lt.s32.totalorder %s1074_s21, 1  ;;  %v1089_v5 = vmov 0   ;;  %vm458_vm4 = vcmask 64512   ;;  %s313_s28 = scalar_lea.vmem [#allocation7], %s1317_s16 }
  0x7b   : > { %785 = vmatprep.subr.mxu1 %v1087_v0  ;;  %787 = vmatprep.mubr.msk.f32.mxu1 %vm1088_vm0, %v1087_v0  ;;  %v373_v17 = vld [vmem:[%s313_s28] sm:$0xff]  ;;  %s361_s17 = scalar_lea.vmem [#allocation9], %s1317_s16  ;;  %s772_s14 = sshll.u32 %s1074_s21, 7 }
  0x7c   : > { %781 = vmatpush3.xpose.msk.msra.mxu0 %vm375_vm1, %v372_v1  ;;  %s363_s24 = scalar_select %p362_p4, %s1074_s21, 1  ;;  %786 = vmatpush3.msra.mxu1 %v373_v17 }
  0x7d   : > { %s1350_s22 = scalar_lea.hbm %s1431_s5, %s772_s14  ;;  %s579_s10 = sshll.u32 %s361_s17, 4  ;;  %s580_s10 = int_to_ptr.vmem [resolvable:$true] %s579_s10 }
  0x7e   : > { %s766_s30 = sshll.u32 %s363_s24, 1  ;;  %s551_s13 = scalar_lea.sflag [#allocation10], %s1314_s29 }
  0x7f   : > { %783 = vmatmul.mubr.msk.f32.vlgmr.msra.gmra.mrb[0].mxu0 %vm375_vm1, %v374_v3  ;;  %s368_s25 = scalar_lea.vmem %s1429_s3, %s766_s30  ;;  %s964_s15 = scalar_lea.vmem %s580_s10, 128 }
  0x80   : > { %v452_v4 = vld [vmem:[%s368_s25] sm:$0x3]  ;;  %p965_p10 = scmp.ne.s32.totalorder %s580_s10, %s964_s15  ;;  %p1461_p12 = scmp.ne.s32.totalorder %s1447_s6, 0 }
  0x81   : > { %vm453_vm2 = vnez %v452_v4  ;;  %s1090_s8 = smov [#allocation9]  }
  0x82   : > { %v454_v6 = vsel %vm453_vm2, 16843009, %v1089_v5  ;;  %p966_p1 = pnand %p965_p10, %p1461_p12  ;;  %s968_s23 = sshll.u32 %s1090_s8, 4  ;;  %s969_s23 = int_to_ptr.vmem [resolvable:$false] %s968_s23 }
  0x83   : > { %v455_v7 = vunpack.c.0.s8 %v454_v6  ;;  %s970_s12 = scalar_lea.vmem %s969_s23, 256  ;;  %p971_p9 = scmp.lt.s32.totalorder %s580_s10, %s969_s23 }
  0x84   : > { %p967_p8 = pneg %p966_p1  ;;  %p972_p6 = scmp.lt.s32.totalorder %s970_s12, %s964_s15 }
  0x85   : > { %vm456_vm3 = vcmp.ne.s32.totalorder %v455_v7, 0 }
  0x86   : > { %p973_p13 = por %p972_p6, %p971_p9 }
  0x88   : > { %p974_p11 = pnand %p973_p13, %p967_p8 }
 0x152   : > { %v448_v8 = vpop.f32.mrb[0].mxu0 }
 0x153   : > { %v457_v9 = vsel %vm456_vm3, -1e+09, %v448_v8  ;;  %v784_v10 = vpop.f32.mrb[1].mxu0 }
 0x154   : > { %v459_v11 = vsel %vm458_vm4, %v457_v9, -inf }
 0x155   : > { %460 = vmax.xlane.f32.xlu0 %v459_v11 }
 0x1e2   : > { %v461_v12 = vpop.xlane.xlu0 %460 }
 0x1e3   : > { %v462_v13 = vsub.f32 %v457_v9, %v461_v12 }
 0x1e5   : > { %v463_v14 = vmul.f32 1.442695, %v462_v13 }
 0x1e7   : > { %870 = vpow2.f32 %v463_v14 }
 0x1f1   : > { %v871_v15 = vpop.eup %870 }
 0x1f2   : > { %v465_v16 = vsel %vm458_vm4, %v871_v15, 0.0 }
 0x1f3   : > { %466 = vadd.xlane.f32.xlu0 %v465_v16 }
 0x280   : > { %v467_v18 = vpop.xlane.xlu0 %466 }
 0x281   : > { %872 = vrcp.f32 %v467_v18 }
 0x28b   : > { %v873_v19 = vpop.eup %872 }
 0x28c   : > { %v469_v20 = vmul.f32 %v873_v19, %v871_v15 }
 0x28e   : > { %788 = vmatmul.mubr.msk.f32.vlgmr.msra.gmra.mrb[0].mxu1 %vm458_vm4, %v469_v20  ;;  %544 = vst.msk [vmem:[%s361_s17] sm:$0xff] %vm458_vm4, %v469_v20 }
 0x28f   : > { %977 = shalt.err (!%p974_p11)
}
 0x290   : > { %s978_s27 = scalar_lea.hbm %s1350_s22, 128  ;;  %s982_s30 = scalar_lea.hbm %s1431_s5, 256 }
 0x291   : > { %p979_p2 = scmp.ne.s32.totalorder %s1350_s22, %s978_s27  ;;  %p983_p3 = scmp.lt.u32.totalorder %s1350_s22, %s1431_s5 }
 0x292   : > { %p984_p0 = scmp.lt.u32.totalorder %s982_s30, %s978_s27  ;;  %p986_p10 = scmp.lt.u32.totalorder %s978_s27, %s1350_s22 }
 0x293   : > { %p980_p5 = pnand %p979_p2, %p1461_p12 }
 0x294   : > { %p985_p4 = por %p984_p0, %p983_p3 }
 0x295   : > { %p981_p7 = pneg %p980_p5 }
 0x296   : > { %p987_p1 = por %p986_p10, %p985_p4 }
 0x298   : > { %p988_p8 = pnand %p987_p1, %p981_p7 }
 0x29a   : > { %991 = shalt.err (!%p988_p8)
}
 0x29b   : > { %797 = dma.vmem_to_hbm [thread:$0]  (%p1461_p12), %s580_s10, 128, %s1350_s22, %s551_s13  }
 0x29c   : > { %s354_s25 = scalar_lea.vmem [#allocation8], %s1317_s16  ;;  %s1376_s11 = scalar_lea.hbm %s1430_s4, %s772_s14 }
 0x29d   : > { %s565_s28 = sshll.u32 %s354_s25, 4  ;;  %s546_s15 = scalar_lea.sflag [#allocation4], %s1314_s29  ;;  %s1378_s28 = int_to_ptr.vmem [resolvable:$true] %s565_s28 }
 0x29e   : > { %s992_s8 = scalar_lea.vmem %s1378_s28, 128  ;;  %s1091_s21 = smov [#allocation8]  }
 0x29f   : > { %p993_p9 = scmp.ne.s32.totalorder %s1378_s28, %s992_s8  ;;  %s996_s16 = sshll.u32 %s1091_s21, 4  ;;  %s997_s16 = int_to_ptr.vmem [resolvable:$false] %s996_s16 }
 0x2a0   : > { %s998_s14 = scalar_lea.vmem %s997_s16, 256  ;;  %p999_p11 = scmp.lt.s32.totalorder %s1378_s28, %s997_s16 }
 0x2a1   : > { %p994_p6 = pnand %p993_p9, %p1461_p12  ;;  %p1000_p2 = scmp.lt.s32.totalorder %s998_s14, %s992_s8 }
 0x2a3   : > { %p995_p13 = pneg %p994_p6  ;;  %p1001_p5 = por %p1000_p2, %p999_p11 }
 0x2a5   : > { %p1002_p7 = pnand %p1001_p5, %p995_p13 }
 0x361   : > { %v539_v21 = vpop.f32.mrb[0].mxu1 }
 0x362   : > { %543 = vst.msk [vmem:[%s354_s25] sm:$0xff] %vm375_vm1, %v539_v21  ;;  %v789_v22 = vpop.f32.mrb[1].mxu1 }
 0x363   : > { %1005 = shalt.err (!%p1002_p7)
}
 0x364   : > { %s1006_s29 = scalar_lea.hbm %s1376_s11, 128  ;;  %s1010_s13 = scalar_lea.hbm %s1430_s4, 256 }
 0x365   : > { %p1007_p3 = scmp.ne.s32.totalorder %s1376_s11, %s1006_s29  ;;  %p1011_p10 = scmp.lt.u32.totalorder %s1376_s11, %s1430_s4 }
 0x366   : > { %p1012_p1 = scmp.lt.u32.totalorder %s1010_s13, %s1006_s29  ;;  %p1014_p9 = scmp.lt.u32.totalorder %s1006_s29, %s1376_s11 }
 0x367   : > { %p1008_p0 = pnand %p1007_p3, %p1461_p12 }
 0x368   : > { %p1013_p8 = por %p1012_p1, %p1011_p10 }
 0x369   : > { %p1009_p4 = pneg %p1008_p0 }
 0x36a   : > { %p1015_p6 = por %p1014_p9, %p1013_p8 }
 0x36c   : > { %p1016_p13 = pnand %p1015_p6, %p1009_p4 }
 0x36e   : > { %1019 = shalt.err (!%p1016_p13)
}
 0x36f   : > { %796 = dma.vmem_to_hbm [thread:$0]  (%p1461_p12), %s1378_s28, 128, %s1376_s11, %s546_s15  }
 0x370 PF: > { %s1462_s27 = sld [smem:[#allocation19_spill]]  ;;  %s1463_s9 = sld [smem:[#allocation16_spill]] }
 0x371   : > { %s591_s24 = sand.u32 1, %s1062_s18  }
 0x372   : > { %s592_s30 = scalar_lea.sflag [#allocation4], %s591_s24 }
 0x376   : > { %p1464_p11 = scmp.ne.s32.totalorder %s1462_s27, 0  ;;  %p1465_p2 = scmp.ge.s32.totalorder %s1463_s9, 2 }
 0x378   : > { %p811_p5 = pnand %p1465_p2, %p1464_p11 }
 0x37a   : > { %1053 = dma.done.wait (!%p811_p5), %s592_s30, 128  }
 0x37b   : > { %1055 = vsyncadd (!%p811_p5), %s592_s30, 4294967168  ;;  %s601_s26 = scalar_lea.sflag [#allocation10], %s591_s24 }
 0x37c   : > { %1057 = dma.done.wait (!%p811_p5), %s601_s26, 128  }
 0x37d   : > { %1059 = vsyncadd (!%p811_p5), %s601_s26, 4294967168  ;;  %s28_s23 = sadd.s32 1, %s1463_s9   ;;  %s1466_s6 = sld [smem:[#allocation18_spill]] }
 0x37e   : > { %p25_p7 = scmp.ge.s32.totalorder %s28_s23, 4   ;;  %s1467_s21 = sld [smem:[#allocation15_spill]] }
 0x37f   : > { %s1468_s22 = sld [smem:[#allocation17_spill]]  ;;  %s1469_s18 = smov %s1066_s19 }
 0x380   : > { %s1470_s19 = smov %s1070_s20  ;;  %27 = sbr.rel (!%p25_p7) target bundleno = 12 (0xc), region = 125 }
 0x383   : > { %s1471_s20 = smov %s1466_s6 }
 0x387   :  { %606 = vsyncpa [#allocation3], 1 }
 0x388   :  { %608 = vsyncpa [#allocation3 + $0x1], 1 }
 0x389   :  { %609 = vsyncpa [#allocation6], 1 }
 0x38a   :  { %611 = vsyncpa [#allocation6 + $0x1], 1 }
 0x38b   :  { %612 = vsyncpa [#allocation4], 1 }
 0x38c   :  { %614 = vsyncpa [#allocation4 + $0x1], 1 }
 0x38d   :  { %615 = vsyncpa [#allocation10], 1 }
 0x38e   :  { %617 = vsyncpa [#allocation10 + $0x1], 1 }

</bundles_post_ra>
